<compile_context>
chip_gen: v7x
topology: tpu7x:2x2x1
jax: 0.10.0
libtpu: 0.0.40
codegen_flags: <defaults>
</compile_context>

<pallas_src>
import functools

import jax
import jax.numpy as jnp
from jax.experimental import pallas as pl
from jax.experimental.pallas import tpu as pltpu

LANE = 128        # TPU lane width: all kernel output stores are padded to this.
ROW_GRID = 2      # >= 2 row tiles so both v7x TensorCores get work.


def _place_lanes(arr, offset, width=LANE):
    """Zero-pad the last axis of `arr` up to `width`, placing it at `offset`."""
    pad_left = offset
    pad_right = width - offset - arr.shape[-1]
    cfg = [(0, 0)] * (arr.ndim - 1) + [(pad_left, pad_right)]
    return jnp.pad(arr, cfg)


# ---------------------------------------------------------------------------
# Kernel 1: fused 1x1-conv projection + per-frame spatial mean pooling
# ---------------------------------------------------------------------------
def _proj_pool_kernel(x_ref, w_ref, b_ref, pool_ref, o_ref, pooled_ref):
    # x:[tm,Cin] bf16, w:[Cin,128] bf16, b:[1,128] f32, pool:[ft,tm] f32
    y = jnp.dot(x_ref[...], w_ref[...], preferred_element_type=jnp.float32)
    y = y + b_ref[...]                                      # f32 epilogue
    o_ref[...] = y                                          # lane-dense store
    # per-frame spatial mean, fused (block-local pooling stencil on the MXU)
    pooled_ref[...] = jnp.dot(pool_ref[...], y,
                              preferred_element_type=jnp.float32)


def project_and_pool(x_nchw, w_padded, b_padded, cout, *,
                     num_row_tiles=ROW_GRID):
    """nn.Conv2d(kernel_size=1) + per-frame spatial mean, fused in one call.

    x_nchw:   [T, Cin, H, W] f32
    w_padded: [Cin, 128] bf16 (real weight in cols [:cout], rest zero)
    b_padded: [1, 128]   f32
    returns (proj_rows [T*H*W, cout] f32 channels-last, pooled [T, cout] f32)
    """
    T, cin, H, W = x_nchw.shape
    hw = H * W
    M = T * hw
    assert T % num_row_tiles == 0 and (M // num_row_tiles) % 8 == 0, \
        "tile sizing assumption"
    tm = M // num_row_tiles
    ft = T // num_row_tiles                                 # frames per row tile

    x_rows = (jnp.transpose(x_nchw, (0, 2, 3, 1))
              .reshape(M, cin).astype(jnp.bfloat16))
    # identical block-local pooling stencil for every grid step
    pool = jnp.repeat(jnp.eye(ft, dtype=jnp.float32), hw, axis=1) / float(hw)

    proj, pooled = pl.pallas_call(
        _proj_pool_kernel,
        out_shape=(jax.ShapeDtypeStruct((M, LANE), jnp.float32),
                   jax.ShapeDtypeStruct((T, LANE), jnp.float32)),
        grid=(num_row_tiles,),
        in_specs=[
            pl.BlockSpec((tm, cin), lambda i: (i, 0)),
            pl.BlockSpec((cin, LANE), lambda i: (0, 0)),
            pl.BlockSpec((1, LANE), lambda i: (0, 0)),
            pl.BlockSpec((ft, tm), lambda i: (0, 0)),
        ],
        out_specs=(pl.BlockSpec((tm, LANE), lambda i: (i, 0)),
                   pl.BlockSpec((ft, LANE), lambda i: (i, 0))),
        compiler_params=pltpu.CompilerParams(
            dimension_semantics=("parallel",)),
    )(x_rows, w_padded, b_padded, pool)
    return proj[:, :cout], pooled[:, :cout]


# ---------------------------------------------------------------------------
# Kernel 2: ALL prediction heads fused (bbox 3-layer, temp 2-layer, action
# 2-layer MLPs).  Activations never leave vregs/VMEM; one lane-dense store.
# Output column layout inside the 128-lane slab:
#   [0:4] bbox (sigmoid)   [4:6] sted   [6:7] actioness
# ---------------------------------------------------------------------------
def _fused_heads_kernel(xb_ref, xt_ref, *refs, use_actioness):
    o_ref = refs[-1]
    (wb1, bb1, wb2, bb2, wb3, bb3,
     wt1, bt1, wt2, bt2) = refs[:10]

    def lin(h, w_ref, b_ref):
        # bf16 operands, f32 MXU accumulation, f32 bias/activation epilogue
        return jnp.dot(h.astype(jnp.bfloat16), w_ref[...],
                       preferred_element_type=jnp.float32) + b_ref[...]

    xb = xb_ref[...]
    xt = xt_ref[...]

    # bbox_embed: Linear+ReLU, Linear+ReLU, Linear -> sigmoid   (cols 0:4)
    h = jnp.maximum(lin(xb, wb1, bb1), 0.0)
    h = jnp.maximum(lin(h, wb2, bb2), 0.0)
    y_bbox = jax.nn.sigmoid(lin(h, wb3, bb3))

    # temp_embed: Linear+ReLU, Linear                           (cols 4:6)
    g = jnp.maximum(lin(xt, wt1, bt1), 0.0)
    y_temp = lin(g, wt2, bt2)

    col = jax.lax.broadcasted_iota(jnp.int32, o_ref.shape, 1)
    if use_actioness:
        wa1, ba1, wa2, ba2 = refs[10:14]
        # action_embed: Linear+ReLU, Linear                     (col 6)
        a = jnp.maximum(lin(xt, wa1, ba1), 0.0)
        y_act = lin(a, wa2, ba2)
        out = jnp.where(col < 4, y_bbox, jnp.where(col < 6, y_temp, y_act))
    else:
        out = jnp.where(col < 4, y_bbox, y_temp)
    o_ref[...] = out


def fused_heads(xb_rows, xt_rows, head_operands, use_actioness, *,
                num_row_tiles=ROW_GRID):
    """xb_rows feeds bbox_embed, xt_rows feeds temp/action heads. [M, hid] f32."""
    M, hid = xb_rows.shape
    quantum = num_row_tiles * 8
    Mp = ((M + quantum - 1) // quantum) * quantum
    if Mp != M:  # padded rows produce garbage (e.g. sigmoid(bias)); sliced below
        xb_rows = jnp.pad(xb_rows, ((0, Mp - M), (0, 0)))
        xt_rows = jnp.pad(xt_rows, ((0, Mp - M), (0, 0)))
    tm = Mp // num_row_tiles

    xb = xb_rows.astype(jnp.bfloat16)
    xt = xt_rows.astype(jnp.bfloat16)

    w_specs = [pl.BlockSpec(w.shape, lambda i: (0, 0)) for w in head_operands]
    out = pl.pallas_call(
        functools.partial(_fused_heads_kernel, use_actioness=use_actioness),
        out_shape=jax.ShapeDtypeStruct((Mp, LANE), jnp.float32),
        grid=(num_row_tiles,),
        in_specs=[pl.BlockSpec((tm, hid), lambda i: (i, 0)),
                  pl.BlockSpec((tm, hid), lambda i: (i, 0))] + w_specs,
        out_specs=pl.BlockSpec((tm, LANE), lambda i: (i, 0)),
        compiler_params=pltpu.CompilerParams(
            dimension_semantics=("parallel",)),
    )(xb, xt, *head_operands)
    return out[:M]


# ---------------------------------------------------------------------------
# Deterministic parameter init (shapes from CGSTVG.__init__)
# ---------------------------------------------------------------------------
def init_linear(key, in_dim, out_dim, scale=0.02):
    kw, kb = jax.random.split(key)
    w = scale * jax.random.normal(kw, (in_dim, out_dim), jnp.float32)
    b = scale * jax.random.normal(kb, (out_dim,), jnp.float32)
    return w, b


def init_mlp(key, in_dim, hid_dim, out_dim, num_layers):
    dims = [in_dim] + [hid_dim] * (num_layers - 1) + [out_dim]
    keys = jax.random.split(key, num_layers)
    return [init_linear(k, a, b) for k, a, b in zip(keys, dims[:-1], dims[1:])]


def _prep_head(params, col_offset):
    """bf16 weights; final-layer weight/bias placed at `col_offset` inside a
    128-wide lane-dense slab; biases pre-reshaped to (1, N) once at init."""
    ops = []
    last = len(params) - 1
    for i, (w, b) in enumerate(params):
        b = b.reshape(1, -1)
        if i == last:
            w = _place_lanes(w, col_offset)
            b = _place_lanes(b, col_offset)
        ops += [w.astype(jnp.bfloat16), b.astype(jnp.float32)]
    return ops


class CGSTVGPallas:
    # head output packing inside the fused kernel's 128-lane slab
    _BBOX_COLS = slice(0, 4)
    _TEMP_COLS = slice(4, 6)
    _ACT_COLS = slice(6, 7)

    def __init__(self, key, vis_fea_dim=64, hidden_dim=32,
                 use_actioness=True, use_aux_loss=True,
                 num_dec_layers=3, num_queries=4):
        self.vis_fea_dim = vis_fea_dim
        self.hidden_dim = hidden_dim
        self.use_actioness = use_actioness
        self.use_aux_loss = use_aux_loss
        self.num_dec_layers = num_dec_layers
        self.num_queries = num_queries

        k = jax.random.split(key, 8)
        # nn.Conv2d(vis_fea_dim, hidden_dim, 1) — pre-padded to 128 lanes, bf16
        w, b = init_linear(k[0], vis_fea_dim, hidden_dim)
        self.input_proj_w = _place_lanes(w, 0).astype(jnp.bfloat16)
        self.input_proj_b = _place_lanes(b.reshape(1, -1), 0).astype(jnp.float32)
        # nn.Conv2d(768, hidden_dim, 1)
        w, b = init_linear(k[1], 768, hidden_dim)
        self.input_proj2_w = _place_lanes(w, 0).astype(jnp.bfloat16)
        self.input_proj2_b = _place_lanes(b.reshape(1, -1), 0).astype(jnp.float32)

        # MLP heads (dropout is identity at inference)
        self.bbox_embed = init_mlp(k[2], hidden_dim, hidden_dim, 4, 3)
        self.temp_embed = init_mlp(k[3], hidden_dim, hidden_dim, 2, 2)
        self.action_embed = (init_mlp(k[4], hidden_dim, hidden_dim, 1, 2)
                             if use_actioness else None)
        # pre-packed fused-head kernel operands (no per-call pad/reshape/cast)
        self.head_operands = (_prep_head(self.bbox_embed, self._BBOX_COLS.start)
                              + _prep_head(self.temp_embed, self._TEMP_COLS.start))
        if use_actioness:
            self.head_operands += _prep_head(self.action_embed,
                                             self._ACT_COLS.start)

        self.backbone_keys = list(jax.random.split(k[5], 3))

    def forward(self, videos, frame_ids, iteration_rate=-1.0):
        NCLIPS, VIEWS_PER_CLIP, FRAMES_PER_CLIP, B = 8, 1, 16, 1
        T, C, H, W = videos.shape
        clips = videos.reshape(NCLIPS, VIEWS_PER_CLIP, B, C, FRAMES_PER_CLIP, H, W)
        clip_indices = frame_ids.reshape(NCLIPS, FRAMES_PER_CLIP)
        del clips, clip_indices
        # TODO(synk): frozen V-JEPA encoder/classifier are external modules; in
        # the reference forward their features are only printed, never consumed.

        # TODO(synk): vis_encoder (CNN backbone + positional embedding) is an
        # external module — deterministic stand-in features of the expected
        # [T, vis_fea_dim, H/8, W/8] shape are used instead.
        Hf, Wf = max(H // 8, 1), max(W // 8, 1)
        vis_raw = jax.random.normal(self.backbone_keys[0],
                                    (T, self.vis_fea_dim, Hf, Wf), jnp.float32)
        # input_proj as a fused Pallas projection; the spatial mean is fused in
        # as a second output, so no NCHW back-transpose is needed.
        vis_rows, pooled_vis = project_and_pool(
            vis_raw, self.input_proj_w, self.input_proj_b, self.hidden_dim)

        # TODO(synk): video-swin backbone (stage '3', 768 channels) is external;
        # deterministic stand-in features are used instead.
        Hs, Ws = max(H // 32, 1), max(W // 32, 1)
        vid_raw = jax.random.normal(self.backbone_keys[1],
                                    (T, 768, Hs, Ws), jnp.float32)
        vid_rows, pooled_vid = project_and_pool(
            vid_raw, self.input_proj2_w, self.input_proj2_b, self.hidden_dim)
        # Full projected maps would only feed the external ground encoder.
        del vis_rows, vid_rows

        # TODO(synk): text_encoder + ground_encoder/decoder transformer stacks
        # are external; decoder hidden states are derived deterministically from
        # the pooled projected features so the Pallas heads see real data.
        L, nq, hid = self.num_dec_layers, self.num_queries, self.hidden_dim
        layer_scale = 1.0 + 0.1 * jnp.arange(1, L + 1, dtype=jnp.float32)
        hs_rows = (layer_scale[:, None, None] * pooled_vis[None]).reshape(L * T, hid)
        time_rows = (layer_scale[:, None, None] * pooled_vid[None]).reshape(L * T, hid)

        # All three prediction heads in one fused Pallas kernel.  The per-query
        # (nq) axis carries no unique data before the bbox MLP, so the head runs
        # on deduplicated [L*T] rows and is broadcast back over nq afterwards.
        heads = fused_heads(hs_rows, time_rows, self.head_operands,
                            self.use_actioness)
        boxes = heads[:, self._BBOX_COLS].reshape(L, T, 4)
        outputs_time = heads[:, self._TEMP_COLS].reshape(L, T, 2)

        refer_anchors = jnp.broadcast_to(boxes[:, :, None, :], (L, T, nq, 4))
        # TODO(synk): stand-in confidence — the real confidence head lives in
        # the external ground_decoder; do not mistake this for model output.
        anchors_conf = jnp.mean(refer_anchors, axis=-1,
                                keepdims=True).reshape(L, T * nq, 1)
        fake_anchors = refer_anchors[-1]
        outputs_coord = refer_anchors.reshape(L, T * nq, 4)        # flatten(1, 2)

        out = {}
        out["pred_boxes"] = outputs_coord[-1]
        out["boxes_conf"] = anchors_conf[-1]
        out["fake_boxes"] = fake_anchors
        out["pred_sted"] = outputs_time[-1]

        outputs_actioness = None
        if self.use_actioness:
            outputs_actioness = heads[:, self._ACT_COLS].reshape(L, T, 1)
            out["pred_actioness"] = outputs_actioness[-1]

        if self.use_aux_loss:
            out["aux_outputs"] = [
                {"pred_sted": a, "pred_boxes": b, "boxes_conf": c}
                for a, b, c in zip(outputs_time[:-1], outputs_coord[:-1],
                                   anchors_conf[:-1])
            ]
            for i_aux in range(len(out["aux_outputs"])):
                if self.use_actioness:
                    out["aux_outputs"][i_aux]["pred_actioness"] = outputs_actioness[i_aux]
        return out


if __name__ == "__main__":
    key = jax.random.PRNGKey(0)
    k_model, k_vid = jax.random.split(key)
    model = CGSTVGPallas(k_model, vis_fea_dim=64, hidden_dim=32)

    # 8 clips x 16 frames (hard-coded in the reference forward), small spatial.
    T, C, H, W = 128, 3, 16, 16
    videos = jax.random.normal(k_vid, (T, C, H, W), jnp.float32)
    frame_ids = jnp.arange(T, dtype=jnp.int32)

    out = model.forward(videos, frame_ids, iteration_rate=-1.0)
    jax.tree_util.tree_map(jax.block_until_ready, out)
    print("KERNEL_OK")
</pallas_src>

<mosaic_0001>
module attributes {stable_mosaic.version = 11 : i64} {
  func.func @_proj_pool_kernel(%arg0: i32, %arg1: memref<256x64xbf16, #tpu.memory_space<vmem>>, %arg2: memref<64x128xbf16, #tpu.memory_space<vmem>>, %arg3: memref<1x128xf32, #tpu.memory_space<vmem>>, %arg4: memref<64x256xf32, #tpu.memory_space<vmem>>, %arg5: memref<256x128xf32, #tpu.memory_space<vmem>>, %arg6: memref<64x128xf32, #tpu.memory_space<vmem>>) attributes {dimension_semantics = [#tpu.dimension_semantics<parallel>], iteration_bounds = array<i64: 2>, scalar_prefetch = 0 : i64, scratch_operands = 0 : i64, tpu.core_type = #tpu.core_type<tc>, window_params = [{transform_indices = @transform_0, window_bounds = array<i64: 256, 64>}, {pipeline_mode = #tpu.pipeline_mode<synchronous>, transform_indices = @transform_1, window_bounds = array<i64: 64, 128>}, {pipeline_mode = #tpu.pipeline_mode<synchronous>, transform_indices = @transform_2, window_bounds = array<i64: 1, 128>}, {pipeline_mode = #tpu.pipeline_mode<synchronous>, transform_indices = @transform_3, window_bounds = array<i64: 64, 256>}, {transform_indices = @transform_4, window_bounds = array<i64: 256, 128>}, {transform_indices = @transform_5, window_bounds = array<i64: 64, 128>}]} {
    %c0 = arith.constant 0 : index
    %c0_0 = arith.constant 0 : index
    %0 = vector.load %arg1[%c0, %c0_0] : memref<256x64xbf16, #tpu.memory_space<vmem>>, vector<256x64xbf16>
    %c0_1 = arith.constant 0 : index
    %c0_2 = arith.constant 0 : index
    %1 = vector.load %arg2[%c0_1, %c0_2] : memref<64x128xbf16, #tpu.memory_space<vmem>>, vector<64x128xbf16>
    %cst = arith.constant dense<0.000000e+00> : vector<256x128xf32>
    %2 = tpu.matmul %0, %1, %cst {dimension_numbers = #tpu.dot_dimension_numbers<[1], [0], [0], [1], [0, 0, 1, 1], [], []>} : vector<256x64xbf16>, vector<64x128xbf16>, vector<256x128xf32> -> vector<256x128xf32>
    %c0_3 = arith.constant 0 : index
    %c0_4 = arith.constant 0 : index
    %3 = vector.load %arg3[%c0_3, %c0_4] : memref<1x128xf32, #tpu.memory_space<vmem>>, vector<1x128xf32>
    %4 = vector.broadcast %3 : vector<1x128xf32> to vector<256x128xf32>
    %5 = arith.addf %2, %4 : vector<256x128xf32>
    %c0_5 = arith.constant 0 : index
    %c0_6 = arith.constant 0 : index
    %6 = vector.load %arg5[%c0_5, %c0_6] : memref<256x128xf32, #tpu.memory_space<vmem>>, vector<256x128xf32>
    tpu.vector_store %arg5[%c0_5, %c0_6], %5 {strides = array<i32>} : memref<256x128xf32, #tpu.memory_space<vmem>>, vector<256x128xf32>,
    %c0_7 = arith.constant 0 : index
    %c0_8 = arith.constant 0 : index
    %7 = vector.load %arg4[%c0_7, %c0_8] : memref<64x256xf32, #tpu.memory_space<vmem>>, vector<64x256xf32>
    %cst_9 = arith.constant dense<0.000000e+00> : vector<64x128xf32>
    %8 = tpu.matmul %7, %5, %cst_9 {dimension_numbers = #tpu.dot_dimension_numbers<[1], [0], [0], [1], [0, 0, 1, 1], [], []>} : vector<64x256xf32>, vector<256x128xf32>, vector<64x128xf32> -> vector<64x128xf32>
    %c0_10 = arith.constant 0 : index
    %c0_11 = arith.constant 0 : index
    %9 = vector.load %arg6[%c0_10, %c0_11] : memref<64x128xf32, #tpu.memory_space<vmem>>, vector<64x128xf32>
    tpu.vector_store %arg6[%c0_10, %c0_11], %8 {strides = array<i32>} : memref<64x128xf32, #tpu.memory_space<vmem>>, vector<64x128xf32>,
    return
  }
  func.func @transform_0(%arg0: i32) -> (i32, i32) {
    %c0_i32 = arith.constant 0 : i32
    %c0_i32_0 = arith.constant 0 : i32
    return %arg0, %c0_i32 : i32, i32
  }
  func.func @transform_1(%arg0: i32) -> (i32, i32) {
    %c0_i32 = arith.constant 0 : i32
    %c0_i32_0 = arith.constant 0 : i32
    %c0_i32_1 = arith.constant 0 : i32
    return %c0_i32, %c0_i32_0 : i32, i32
  }
  func.func @transform_2(%arg0: i32) -> (i32, i32) {
    %c0_i32 = arith.constant 0 : i32
    %c0_i32_0 = arith.constant 0 : i32
    %c0_i32_1 = arith.constant 0 : i32
    return %c0_i32, %c0_i32_0 : i32, i32
  }
  func.func @transform_3(%arg0: i32) -> (i32, i32) {
    %c0_i32 = arith.constant 0 : i32
    %c0_i32_0 = arith.constant 0 : i32
    %c0_i32_1 = arith.constant 0 : i32
    return %c0_i32, %c0_i32_0 : i32, i32
  }
  func.func @transform_4(%arg0: i32) -> (i32, i32) {
    %c0_i32 = arith.constant 0 : i32
    %c0_i32_0 = arith.constant 0 : i32
    return %arg0, %c0_i32 : i32, i32
  }
  func.func @transform_5(%arg0: i32) -> (i32, i32) {
    %c0_i32 = arith.constant 0 : i32
    %c0_i32_0 = arith.constant 0 : i32
    return %arg0, %c0_i32 : i32, i32
  }
}

</mosaic_0001>

<bundles_post_ra>
// kernel: tpu_custom_call.1
= control target key start
LH: loop header
LB: loop body
LE: loop exit
PB: predicated region body
PF: predicated region fallthrough
CT: control target
= control target key end

     0   :  { %11 = vsyncpa [#allocation3], 0  ;;  %s1695_s0 = inlined_call_operand.vmem [shape: bf16[512,64], index: 0, kind: input, shape index: {}]   ;;  %s1696_s1 = inlined_call_operand.vmem [shape: bf16[64,128], index: 1, kind: input, shape index: {}]   ;;  %s1697_s2 = inlined_call_operand.vmem [shape: f32[1,128], index: 2, kind: input, shape index: {}]   ;;  %s1698_s3 = inlined_call_operand.vmem [shape: f32[64,256], index: 3, kind: input, shape index: {}]   ;;  %s1699_s4 = inlined_call_operand.hbm [shape: f32[512,128], index: 4, kind: output, shape index: {0}]   ;;  %s1700_s5 = inlined_call_operand.hbm [shape: f32[128,128], index: 5, kind: output, shape index: {1}]  }
   0x1   :  { %13 = vsyncpa [#allocation3 + $0x1], 0 }
   0x2   :  { %14 = vsyncpa [#allocation5], 0 }
   0x3   :  { %16 = vsyncpa [#allocation5 + $0x1], 0  ;;  %s1289_s18 = smov 0   ;;  %s1291_s19 = smov 0  }
   0x4   :  { %s1293_s20 = smov 0   ;;  %s1295_s21 = smov 0  }
   0x5 LB: > { %s1310_s22 = sadd.s32 4294967295, %s1253_s21   ;;  %s890_s23 = sadd.s32 4294967294, %s1253_s21   ;;  %s1253_s21 = sphi %s1295_s21, %s1706_s21   ;;  %s1249_s20 = sphi %s1293_s20, %s1705_s20   ;;  %s1245_s19 = sphi %s1291_s19, %s1704_s19   ;;  %s1241_s18 = sphi %s1289_s18, %s1703_s18  }
   0x6   : > { %s1314_s24 = sadd.s32 1, %s1253_s21   ;;  %s118_s25 = sadd.s32 1, %s1249_s20 }
   0x7   : > { %s115_s26 = ssub.s32 %s1253_s21, %s1314_s24  ;;  %p128_p0 = scmp.ne.s32.totalorder %s1249_s20, %s1245_s19 }
   0x8   : > { %p116_p1 = scmp.eq.s32.totalorder %s115_s26, 0  ;;  %p129_p2 = scmp.eq.s32.totalorder %s1310_s22, 1 }
   0x9   : > { %p134_p3 = scmp.ne.s32.totalorder %s1245_s19, %s1241_s18  ;;  %p135_p4 = scmp.eq.s32.totalorder %s890_s23, 1 }
   0xa   : > { %s1325_s27 = scalar_select %p116_p1, %s1249_s20, %s118_s25  }
   0xb   : > { %p1327_p5 = por %p129_p2, %p128_p0  ;;  %p1331_p6 = por %p135_p4, %p134_p3 }
   0xc   : > { %p893_p7 = scmp.ge.s32.totalorder %s1253_s21, 1  ;;  %p197_p8 = scmp.lt.s32.totalorder %s1253_s21, 3 }
   0xe   : > { %p198_p9 = pnand %p893_p7, %p197_p8 }
   0xf   : > { %v1139_v0 = vld [vmem:[%s1696_s1] sm:$0xff] (!%p198_p9)   ;;  %s896_s7 = sshll.u32 (!%p198_p9), %s1310_s22, 5  ;;  %v1140_v1 = vld [vmem:[%s1696_s1 + $0x8] sm:$0xff] (!%p198_p9)   ;;  %v1141_v2 = vld [vmem:[%s1696_s1 + $0x10] sm:$0xff] (!%p198_p9)   ;;  %vm390_vm0 = vcmask (!%p198_p9), 523264   ;;  %s1391_s26 = sand.u32 (!%p198_p9), 1, %s1245_s19  }
  0x10   : > { %201 = sbr.rel (%p198_p9) target bundleno = 572 (0x23c), region = 36  ;;  %p231_p10 = scmp.lt.s32.totalorder (!%p198_p9), %s896_s7, 63  ;;  %1021 = vmatprep.subr.bf16.mxu0 (!%p198_p9), %v1139_v0  ;;  %v1142_v4 = vld [vmem:[%s1696_s1 + $0x18] sm:$0xff] (!%p198_p9)   ;;  %v633_v20 = vld [vmem:[%s1698_s3 + $0x8] sm:$0xff] (!%p198_p9)  ;;  %v1397_v21 = vld [vmem:[%s1697_s2] ss:$0 sm:$0xff] (!%p198_p9) }
  0x11   : > { %1022 = vmatpush3.bf16.msra.mxu0 (!%p198_p9), %v1139_v0  ;;  %712 = vmatprep.mubr.f32.mxu1 (!%p198_p9), %v633_v20  ;;  %s894_s30 = sshll.u32 (!%p198_p9), %s1391_s26, 8  ;;  %s943_s11 = sshll.u32 (!%p198_p9), %s1310_s22, 12 }
  0x12   : > { %1023 = vmatprep.subr.bf16.mxu0 (!%p198_p9), %v1140_v1  ;;  %s1405_s8 = scalar_lea.vmem (!%p198_p9), [#allocation2], %s894_s30  ;;  %s762_s16 = scalar_lea.sflag (!%p198_p9), [#allocation3], %s1391_s26 }
  0x13   : > { %s1255_s23 = smov (!%p198_p9), [#allocation2]  }
  0x14   : > { %s1163_s25 = sshll.u32 (!%p198_p9), %s1255_s23, 4  ;;  %s1164_s25 = int_to_ptr.vmem [resolvable:$false] %s1163_s25 }
  0x15   : > { %1024 = vmatpush3.bf16.msra.mxu0 (!%p198_p9), %v1140_v1 }
  0x16   : > { %1025 = vmatprep.subr.bf16.mxu0 (!%p198_p9), %v1141_v2 }
  0x17   : > { %s1708_s7 = smov (!%p231_p10, %s896_s7), 63 }
  0x18   : > { %s897_s12 = sshll.u32 %s1708_s7, 2 }
  0x19   : > { %s1350_s15 = scalar_lea.vmem %s1695_s0, %s897_s12  ;;  %1026 = vmatpush3.bf16.msra.mxu0 %v1141_v2  ;;  %s780_s12 = sshll.u32 %s1405_s8, 4  ;;  %s1602_s12 = int_to_ptr.vmem [resolvable:$true] %s780_s12 }
  0x1a   : > { %v1143_v3 = vld [vmem:[%s1350_s15] sm:$0xff]   ;;  %1027 = vmatprep.subr.bf16.mxu0 %v1142_v4  ;;  %v1144_v5 = vld [vmem:[%s1350_s15 + $0x8] sm:$0xff]   ;;  %v1145_v6 = vld [vmem:[%s1350_s15 + $0x10] sm:$0xff]   ;;  %s1159_s17 = scalar_lea.vmem %s1602_s12, 4096  ;;  %p1166_p0 = scmp.lt.s32.totalorder %s1602_s12, %s1164_s25 }
  0x1b   : > { %1029 = vmatprep.mubr.msk.bf16.mxu0 %vm390_vm0, %v1143_v3  ;;  %v1146_v7 = vld [vmem:[%s1350_s15 + $0x18] sm:$0xff]   ;;  %v1147_v8 = vld [vmem:[%s1350_s15 + $0x20] sm:$0xff]   ;;  %v1148_v9 = vld [vmem:[%s1350_s15 + $0x28] sm:$0xff]   ;;  %p1160_p11 = scmp.ne.s32.totalorder %s1602_s12, %s1159_s17 }
  0x1c   : > { %v1149_v10 = vld [vmem:[%s1350_s15 + $0x30] sm:$0xff]   ;;  %v1150_v11 = vld [vmem:[%s1350_s15 + $0x38] sm:$0xff]   ;;  %v1151_v12 = vld [vmem:[%s1350_s15 + $0x40] sm:$0xff]  }
  0x1d   : > { %1028 = vmatpush3.bf16.msra.mxu0 %v1142_v4  ;;  %v1152_v13 = vld [vmem:[%s1350_s15 + $0x48] sm:$0xff]   ;;  %v1153_v14 = vld [vmem:[%s1350_s15 + $0x50] sm:$0xff]   ;;  %v1154_v15 = vld [vmem:[%s1350_s15 + $0x58] sm:$0xff]   ;;  %p1161_p12 = pnand %p1160_p11, %p1327_p5 }
  0x1e   : > { %v1155_v16 = vld [vmem:[%s1350_s15 + $0x60] sm:$0xff]   ;;  %v1156_v17 = vld [vmem:[%s1350_s15 + $0x68] sm:$0xff]   ;;  %v1157_v18 = vld [vmem:[%s1350_s15 + $0x70] sm:$0xff]  }
  0x1f   : > { %v1158_v19 = vld [vmem:[%s1350_s15 + $0x78] sm:$0xff]   ;;  %s1600_s15 = scalar_lea.hbm %s1699_s4, %s943_s11  ;;  %p1162_p13 = pneg %p1161_p12 }
  0x20   : > { %1030 = vmatmul.mubr.msk.bf16.vlgmr.msra.gmra.mrb[0].mxu0 %vm390_vm0, %v1144_v5 }
  0x21   : > { %1033 = vmatprep.mubr.msk.bf16.mxu0 %vm390_vm0, %v1145_v6 }
  0x28   : > { %1034 = vmatmul.mubr.msk.bf16.gmra.mrb[4].mxu0 %vm390_vm0, %v1146_v7 }
  0x29   : > { %1037 = vmatprep.mubr.msk.bf16.mxu0 %vm390_vm0, %v1147_v8 }
  0x30   : > { %1038 = vmatmul.mubr.msk.bf16.gmra.mrb[8].mxu0 %vm390_vm0, %v1148_v9 }
  0x31   : > { %1041 = vmatprep.mubr.msk.bf16.mxu0 %vm390_vm0, %v1149_v10 }
  0x38   : > { %1042 = vmatmul.mubr.msk.bf16.gmra.mrb[12].mxu0 %vm390_vm0, %v1150_v11 }
  0x39   : > { %1045 = vmatprep.mubr.msk.bf16.mxu0 %vm390_vm0, %v1151_v12 }
  0x40   : > { %1046 = vmatmul.mubr.msk.bf16.gmra.mrb[16].mxu0 %vm390_vm0, %v1152_v13 }
  0x41   : > { %1049 = vmatprep.mubr.msk.bf16.mxu0 %vm390_vm0, %v1153_v14 }
  0x48   : > { %1050 = vmatmul.mubr.msk.bf16.gmra.mrb[20].mxu0 %vm390_vm0, %v1154_v15 }
  0x49   : > { %1053 = vmatprep.mubr.msk.bf16.mxu0 %vm390_vm0, %v1155_v16 }
  0x50   : > { %1054 = vmatmul.mubr.msk.bf16.gmra.mrb[24].mxu0 %vm390_vm0, %v1156_v17 }
  0x51   : > { %1057 = vmatprep.mubr.msk.bf16.mxu0 %vm390_vm0, %v1157_v18 }
  0x58   : > { %1058 = vmatmul.mubr.msk.bf16.gmra.mrb[28].mxu0 %vm390_vm0, %v1158_v19 }
  0xf3   : > { %v1031_v22 = vpop.f32.mrb[0].mxu0 }
  0xf4   : > { %v1400_v23 = vadd.f32 %v1031_v22, %v1397_v21  ;;  %v473_v24 = vpop.f32.mrb[1].mxu0 }
  0xf5   : > { %v1403_v25 = vadd.f32 %v1397_v21, %v473_v24  ;;  %v1032_v26 = vpop.f32.mrb[2].mxu0 }
  0xf6   : > { %602 = vst [vmem:[%s1405_s8 + $0x10] sm:$0xff] %v1400_v23  ;;  %v1410_v27 = vadd.f32 %v1032_v26, %v1397_v21  ;;  %v476_v28 = vpop.f32.mrb[3].mxu0 }
  0xf7   : > { %600 = vst [vmem:[%s1405_s8] sm:$0xff] %v1403_v25  ;;  %v1415_v29 = vadd.f32 %v1397_v21, %v476_v28 }
  0xf8   : > { %603 = vst [vmem:[%s1405_s8 + $0x18] sm:$0xff] %v1410_v27  ;;  %v1067_v30 = vpack.c.bf16 %v1410_v27, %v1400_v23 }
  0xf9   : > { %601 = vst [vmem:[%s1405_s8 + $0x8] sm:$0xff] %v1415_v29  ;;  %v1063_v31 = vpack.c.bf16 %v1415_v29, %v1403_v25 }
  0xfb   : > { %v1035_v32 = vpop.f32.mrb[4].mxu0 }
  0xfc   : > { %v1426_v33 = vadd.f32 %v1035_v32, %v1397_v21  ;;  %v489_v34 = vpop.f32.mrb[5].mxu0 }
  0xfd   : > { %v1429_v35 = vadd.f32 %v1397_v21, %v489_v34  ;;  %v1036_v36 = vpop.f32.mrb[6].mxu0 }
  0xfe   : > { %606 = vst [vmem:[%s1405_s8 + $0x30] sm:$0xff] %v1426_v33  ;;  %v1434_v37 = vadd.f32 %v1036_v36, %v1397_v21  ;;  %v492_v38 = vpop.f32.mrb[7].mxu0 }
  0xff   : > { %604 = vst [vmem:[%s1405_s8 + $0x20] sm:$0xff] %v1429_v35  ;;  %v1439_v39 = vadd.f32 %v1397_v21, %v492_v38 }
 0x100   : > { %607 = vst [vmem:[%s1405_s8 + $0x38] sm:$0xff] %v1434_v37  ;;  %v1075_v40 = vpack.c.bf16 %v1434_v37, %v1426_v33 }
 0x101   : > { %605 = vst [vmem:[%s1405_s8 + $0x28] sm:$0xff] %v1439_v39  ;;  %v1071_v41 = vpack.c.bf16 %v1439_v39, %v1429_v35  ;;  %v635_v39 = vld [vmem:[%s1698_s3 + $0x18] sm:$0xff] }
 0x103   : > { %v1039_v42 = vpop.f32.mrb[8].mxu0 }
 0x104   : > { %v1450_v43 = vadd.f32 %v1039_v42, %v1397_v21  ;;  %v505_v44 = vpop.f32.mrb[9].mxu0  ;;  %v636_v42 = vld [vmem:[%s1698_s3 + $0x20] sm:$0xff] }
 0x105   : > { %v1453_v45 = vadd.f32 %v1397_v21, %v505_v44  ;;  %v1040_v46 = vpop.f32.mrb[10].mxu0  ;;  %v638_v44 = vld [vmem:[%s1698_s3 + $0x30] sm:$0xff] }
 0x106   : > { %610 = vst [vmem:[%s1405_s8 + $0x50] sm:$0xff] %v1450_v43  ;;  %v1458_v47 = vadd.f32 %v1040_v46, %v1397_v21  ;;  %v508_v48 = vpop.f32.mrb[11].mxu0  ;;  %v640_v46 = vld [vmem:[%s1698_s3 + $0x40] sm:$0xff] }
 0x107   : > { %608 = vst [vmem:[%s1405_s8 + $0x40] sm:$0xff] %v1453_v45  ;;  %v1463_v49 = vadd.f32 %v1397_v21, %v508_v48  ;;  %v642_v48 = vld [vmem:[%s1698_s3 + $0x50] sm:$0xff] }
 0x108   : > { %611 = vst [vmem:[%s1405_s8 + $0x58] sm:$0xff] %v1458_v47  ;;  %v1083_v50 = vpack.c.bf16 %v1458_v47, %v1450_v43  ;;  %v639_v43 = vld [vmem:[%s1698_s3 + $0x38] sm:$0xff] }
 0x109   : > { %609 = vst [vmem:[%s1405_s8 + $0x48] sm:$0xff] %v1463_v49  ;;  %v1079_v51 = vpack.c.bf16 %v1463_v49, %v1453_v45  ;;  %v641_v45 = vld [vmem:[%s1698_s3 + $0x48] sm:$0xff]  ;;  %v643_v47 = vld [vmem:[%s1698_s3 + $0x58] sm:$0xff] }
 0x10a   : > { %v645_v49 = vld [vmem:[%s1698_s3 + $0x68] sm:$0xff] }
 0x10b   : > { %v1043_v52 = vpop.f32.mrb[12].mxu0 }
 0x10c   : > { %v1474_v53 = vadd.f32 %v1043_v52, %v1397_v21  ;;  %v521_v54 = vpop.f32.mrb[13].mxu0  ;;  %v646_v52 = vld [vmem:[%s1698_s3 + $0x70] sm:$0xff] }
 0x10d   : > { %v1477_v55 = vadd.f32 %v1397_v21, %v521_v54  ;;  %v1044_v56 = vpop.f32.mrb[14].mxu0 }
 0x10e   : > { %614 = vst [vmem:[%s1405_s8 + $0x70] sm:$0xff] %v1474_v53  ;;  %v1482_v57 = vadd.f32 %v1044_v56, %v1397_v21  ;;  %v524_v58 = vpop.f32.mrb[15].mxu0 }
 0x10f   : > { %612 = vst [vmem:[%s1405_s8 + $0x60] sm:$0xff] %v1477_v55  ;;  %v1487_v59 = vadd.f32 %v1397_v21, %v524_v58 }
 0x110   : > { %615 = vst [vmem:[%s1405_s8 + $0x78] sm:$0xff] %v1482_v57  ;;  %v1091_v60 = vpack.c.bf16 %v1482_v57, %v1474_v53 }
 0x111   : > { %613 = vst [vmem:[%s1405_s8 + $0x68] sm:$0xff] %v1487_v59  ;;  %v1087_v61 = vpack.c.bf16 %v1487_v59, %v1477_v55 }
 0x113   : > { %v1047_v62 = vpop.f32.mrb[16].mxu0 }
 0x114   : > { %v546_v63 = vadd.f32 %v1047_v62, %v1397_v21  ;;  %v537_v0 = vpop.f32.mrb[17].mxu0 }
 0x115   : > { %v538_v1 = vadd.f32 %v1397_v21, %v537_v0  ;;  %v1048_v2 = vpop.f32.mrb[18].mxu0 }
 0x116   : > { %618 = vst [vmem:[%s1405_s8 + $0x90] sm:$0xff] %v546_v63  ;;  %v549_v3 = vadd.f32 %v1048_v2, %v1397_v21  ;;  %v540_v4 = vpop.f32.mrb[19].mxu0 }
 0x117   : > { %616 = vst [vmem:[%s1405_s8 + $0x80] sm:$0xff] %v538_v1  ;;  %v541_v5 = vadd.f32 %v1397_v21, %v540_v4 }
 0x118   : > { %619 = vst [vmem:[%s1405_s8 + $0x98] sm:$0xff] %v549_v3  ;;  %v1065_v6 = vpack.c.bf16 %v549_v3, %v546_v63 }
 0x119   : > { %617 = vst [vmem:[%s1405_s8 + $0x88] sm:$0xff] %v541_v5  ;;  %v1061_v7 = vpack.c.bf16 %v541_v5, %v538_v1 }
 0x11b   : > { %v1051_v8 = vpop.f32.mrb[20].mxu0  ;;  %1062 = vmatprep.subr.bf16.mxu1 %v1061_v7 }
 0x11c   : > { %v562_v9 = vadd.f32 %v1051_v8, %v1397_v21  ;;  %v553_v10 = vpop.f32.mrb[21].mxu0  ;;  %1064 = vmatpush3.bf16.msra.mxu1 %v1063_v31 }
 0x11d   : > { %v554_v11 = vadd.f32 %v1397_v21, %v553_v10  ;;  %v1052_v12 = vpop.f32.mrb[22].mxu0  ;;  %1066 = vmatprep.subr.bf16.mxu1 %v1065_v6 }
 0x11e   : > { %622 = vst [vmem:[%s1405_s8 + $0xb0] sm:$0xff] %v562_v9  ;;  %v565_v13 = vadd.f32 %v1052_v12, %v1397_v21  ;;  %v556_v14 = vpop.f32.mrb[23].mxu0 }
 0x11f   : > { %620 = vst [vmem:[%s1405_s8 + $0xa0] sm:$0xff] %v554_v11  ;;  %v557_v15 = vadd.f32 %v1397_v21, %v556_v14 }
 0x120   : > { %623 = vst [vmem:[%s1405_s8 + $0xb8] sm:$0xff] %v565_v13  ;;  %v1073_v16 = vpack.c.bf16 %v565_v13, %v562_v9  ;;  %1068 = vmatpush3.bf16.msra.mxu1 %v1067_v30 }
 0x121   : > { %621 = vst [vmem:[%s1405_s8 + $0xa8] sm:$0xff] %v557_v15  ;;  %v1069_v17 = vpack.c.bf16 %v557_v15, %v554_v11 }
 0x123   : > { %v1055_v18 = vpop.f32.mrb[24].mxu0  ;;  %1070 = vmatprep.subr.bf16.mxu1 %v1069_v17 }
 0x124   : > { %v578_v19 = vadd.f32 %v1055_v18, %v1397_v21  ;;  %v569_v20 = vpop.f32.mrb[25].mxu0  ;;  %1072 = vmatpush3.bf16.msra.mxu1 %v1071_v41  ;;  %v637_v41 = vld [vmem:[%s1698_s3 + $0x28] sm:$0xff] }
 0x125   : > { %v570_v22 = vadd.f32 %v1397_v21, %v569_v20  ;;  %v1056_v24 = vpop.f32.mrb[26].mxu0  ;;  %1074 = vmatprep.subr.bf16.mxu1 %v1073_v16 }
 0x126   : > { %626 = vst [vmem:[%s1405_s8 + $0xd0] sm:$0xff] %v578_v19  ;;  %v581_v23 = vadd.f32 %v1056_v24, %v1397_v21  ;;  %v572_v25 = vpop.f32.mrb[27].mxu0 }
 0x127   : > { %624 = vst [vmem:[%s1405_s8 + $0xc0] sm:$0xff] %v570_v22  ;;  %v573_v26 = vadd.f32 %v1397_v21, %v572_v25 }
 0x128   : > { %627 = vst [vmem:[%s1405_s8 + $0xd8] sm:$0xff] %v581_v23  ;;  %v1081_v27 = vpack.c.bf16 %v581_v23, %v578_v19  ;;  %1076 = vmatpush3.bf16.msra.mxu1 %v1075_v40  ;;  %v634_v40 = vld [vmem:[%s1698_s3 + $0x10] sm:$0xff] }
 0x129   : > { %625 = vst [vmem:[%s1405_s8 + $0xc8] sm:$0xff] %v573_v26  ;;  %v1077_v28 = vpack.c.bf16 %v573_v26, %v570_v22 }
 0x12b   : > { %v1059_v29 = vpop.f32.mrb[28].mxu0  ;;  %1078 = vmatprep.subr.bf16.mxu1 %v1077_v28 }
 0x12c   : > { %v594_v30 = vadd.f32 %v1059_v29, %v1397_v21  ;;  %v585_v31 = vpop.f32.mrb[29].mxu0  ;;  %1080 = vmatpush3.bf16.msra.mxu1 %v1079_v51  ;;  %v647_v51 = vld [vmem:[%s1698_s3 + $0x78] sm:$0xff] }
 0x12d   : > { %v586_v32 = vadd.f32 %v1397_v21, %v585_v31  ;;  %v1060_v34 = vpop.f32.mrb[30].mxu0  ;;  %1082 = vmatprep.subr.bf16.mxu1 %v1081_v27 }
 0x12e   : > { %630 = vst [vmem:[%s1405_s8 + $0xf0] sm:$0xff] %v594_v30  ;;  %v597_v33 = vadd.f32 %v1060_v34, %v1397_v21  ;;  %v588_v35 = vpop.f32.mrb[31].mxu0 }
 0x12f   : > { %628 = vst [vmem:[%s1405_s8 + $0xe0] sm:$0xff] %v586_v32  ;;  %v589_v36 = vadd.f32 %v1397_v21, %v588_v35  ;;  %v632_v21 = vld [vmem:[%s1698_s3] sm:$0xff] }
 0x130   : > { %631 = vst [vmem:[%s1405_s8 + $0xf8] sm:$0xff] %v597_v33  ;;  %v1089_v37 = vpack.c.bf16 %v597_v33, %v594_v30  ;;  %1084 = vmatpush3.bf16.msra.mxu1 %v1083_v50  ;;  %v644_v50 = vld [vmem:[%s1698_s3 + $0x60] sm:$0xff] }
 0x131   : > { %629 = vst [vmem:[%s1405_s8 + $0xe8] sm:$0xff] %v589_v36  ;;  %v1085_v38 = vpack.c.bf16 %v589_v36, %v586_v32  ;;  %s1165_s8 = scalar_lea.vmem %s1164_s25, 8192 }
 0x132   : > { %p1167_p1 = scmp.lt.s32.totalorder %s1165_s8, %s1159_s17 }
 0x133   : > { %1086 = vmatprep.subr.bf16.mxu1 %v1085_v38 }
 0x134   : > { %1088 = vmatpush3.bf16.msra.mxu1 %v1087_v61  ;;  %p1168_p2 = por %p1167_p1, %p1166_p0 }
 0x135   : > { %1090 = vmatprep.subr.bf16.mxu1 %v1089_v37 }
 0x136   : > { %p1169_p3 = pnand %p1168_p2, %p1162_p13 }
 0x138   : > { %1092 = vmatpush3.bf16.msra.mxu1 %v1091_v60 }
 0x13b   : > { %713 = vmatmul.mubr.f32.vlgmr.msra.gmra.mrb[0].mxu1 %v632_v21 }
 0x13c   : > { %717 = vmatprep.mubr.f32.mxu1 %v635_v39 }
 0x13f   : > { %718 = vmatmul.mubr.f32.gmra.mrb[2].mxu1 %v634_v40 }
 0x140   : > { %722 = vmatprep.mubr.f32.mxu1 %v637_v41 }
 0x143   : > { %723 = vmatmul.mubr.f32.gmra.mrb[4].mxu1 %v636_v42 }
 0x144   : > { %727 = vmatprep.mubr.f32.mxu1 %v639_v43 }
 0x147   : > { %728 = vmatmul.mubr.f32.gmra.mrb[6].mxu1 %v638_v44 }
 0x148   : > { %732 = vmatprep.mubr.f32.mxu1 %v641_v45 }
 0x14b   : > { %733 = vmatmul.mubr.f32.gmra.mrb[8].mxu1 %v640_v46 }
 0x14c   : > { %737 = vmatprep.mubr.f32.mxu1 %v643_v47 }
 0x14f   : > { %738 = vmatmul.mubr.f32.gmra.mrb[10].mxu1 %v642_v48 }
 0x150   : > { %742 = vmatprep.mubr.f32.mxu1 %v645_v49 }
 0x153   : > { %743 = vmatmul.mubr.f32.gmra.mrb[12].mxu1 %v644_v50 }
 0x154   : > { %747 = vmatprep.mubr.f32.mxu1 %v647_v51 }
 0x157   : > { %748 = vmatmul.mubr.f32.gmra.mrb[14].mxu1 %v646_v52 }
 0x158   : > { %1172 = shalt.err (!%p1169_p3)
}
 0x159   : > { %s1173_s30 = scalar_lea.hbm %s1600_s15, 4096  ;;  %s1177_s9 = scalar_lea.hbm %s1699_s4, 8192 }
 0x15a   : > { %p1174_p4 = scmp.ne.s32.totalorder %s1600_s15, %s1173_s30  ;;  %p1178_p9 = scmp.lt.u32.totalorder %s1600_s15, %s1699_s4 }
 0x15b   : > { %p1179_p10 = scmp.lt.u32.totalorder %s1177_s9, %s1173_s30  ;;  %p1181_p12 = scmp.lt.u32.totalorder %s1173_s30, %s1600_s15 }
 0x15c   : > { %p1175_p7 = pnand %p1174_p4, %p1327_p5 }
 0x15d   : > { %p1180_p11 = por %p1179_p10, %p1178_p9 }
 0x15e   : > { %p1176_p8 = pneg %p1175_p7 }
 0x15f   : > { %p1182_p13 = por %p1181_p12, %p1180_p11 }
 0x161   : > { %p1183_p0 = pnand %p1182_p13, %p1176_p8 }
 0x163   : > { %1186 = shalt.err (!%p1183_p0)
}
 0x164   : > { %s1256_s13 = smov 128   ;;  %s1257_s14 = smov 8  }
 0x165   : > { %1093 = dma.vmem_to_hbm [thread:$0]  (%p1327_p5), %s1602_s12, 4096, %s1600_s15, %s762_s16, %s1256_s13, %s1256_s13, %s1257_s14  }
 0x166   : > { %s895_s17 = sshll.u32 %s1391_s26, 6  ;;  %s944_s12 = sshll.u32 %s1310_s22, 10 }
 0x167   : > { %s1632_s23 = scalar_lea.vmem [#allocation4], %s895_s17  ;;  %s1646_s8 = scalar_lea.hbm %s1700_s5, %s944_s12 }
 0x168   : > { %s796_s15 = sshll.u32 %s1632_s23, 4  ;;  %s767_s30 = scalar_lea.sflag [#allocation5], %s1391_s26  ;;  %s1648_s15 = int_to_ptr.vmem [resolvable:$true] %s796_s15 }
 0x169   : > { %s1187_s6 = scalar_lea.vmem %s1648_s15, 1024  ;;  %s1258_s22 = smov [#allocation4]  }
 0x16a   : > { %p1188_p1 = scmp.ne.s32.totalorder %s1648_s15, %s1187_s6  ;;  %s1191_s7 = sshll.u32 %s1258_s22, 4  ;;  %s1192_s7 = int_to_ptr.vmem [resolvable:$false] %s1191_s7 }
 0x16b   : > { %s1193_s9 = scalar_lea.vmem %s1192_s7, 2048  ;;  %p1194_p4 = scmp.lt.s32.totalorder %s1648_s15, %s1192_s7 }
 0x16c   : > { %p1189_p2 = pnand %p1188_p1, %p1327_p5  ;;  %p1195_p7 = scmp.lt.s32.totalorder %s1193_s9, %s1187_s6 }
 0x16e   : > { %p1190_p3 = pneg %p1189_p2  ;;  %p1196_p8 = por %p1195_p7, %p1194_p4 }
 0x170   : > { %p1197_p9 = pnand %p1196_p8, %p1190_p3 }
 0x20e   : > { %v997_v53 = vpop.f32.mrb[0].mxu1 }
 0x20f   : > { %v998_v54 = vpop.f32.mrb[1].mxu1 }
 0x210   : > { %v999_v55 = vadd.f32 %v998_v54, %v997_v53 }
 0x212   : > { %753 = vst [vmem:[%s1632_s23] sm:$0xff] %v999_v55  ;;  %v1000_v56 = vpop.f32.mrb[2].mxu1 }
 0x213   : > { %v1001_v57 = vpop.f32.mrb[3].mxu1 }
 0x214   : > { %v1002_v58 = vadd.f32 %v1001_v57, %v1000_v56 }
 0x216   : > { %754 = vst [vmem:[%s1632_s23 + $0x8] sm:$0xff] %v1002_v58  ;;  %v1003_v59 = vpop.f32.mrb[4].mxu1 }
 0x217   : > { %v1004_v60 = vpop.f32.mrb[5].mxu1 }
 0x218   : > { %v1005_v61 = vadd.f32 %v1004_v60, %v1003_v59 }
 0x21a   : > { %755 = vst [vmem:[%s1632_s23 + $0x10] sm:$0xff] %v1005_v61  ;;  %v1006_v62 = vpop.f32.mrb[6].mxu1 }
 0x21b   : > { %v1007_v63 = vpop.f32.mrb[7].mxu1 }
 0x21c   : > { %v1008_v0 = vadd.f32 %v1007_v63, %v1006_v62 }
 0x21e   : > { %756 = vst [vmem:[%s1632_s23 + $0x18] sm:$0xff] %v1008_v0  ;;  %v1009_v1 = vpop.f32.mrb[8].mxu1 }
 0x21f   : > { %v1010_v2 = vpop.f32.mrb[9].mxu1 }
 0x220   : > { %v1011_v3 = vadd.f32 %v1010_v2, %v1009_v1 }
 0x222   : > { %757 = vst [vmem:[%s1632_s23 + $0x20] sm:$0xff] %v1011_v3  ;;  %v1012_v4 = vpop.f32.mrb[10].mxu1 }
 0x223   : > { %v1013_v5 = vpop.f32.mrb[11].mxu1 }
 0x224   : > { %v1014_v6 = vadd.f32 %v1013_v5, %v1012_v4 }
 0x226   : > { %758 = vst [vmem:[%s1632_s23 + $0x28] sm:$0xff] %v1014_v6  ;;  %v1015_v7 = vpop.f32.mrb[12].mxu1 }
 0x227   : > { %v1016_v8 = vpop.f32.mrb[13].mxu1 }
 0x228   : > { %v1017_v9 = vadd.f32 %v1016_v8, %v1015_v7 }
 0x22a   : > { %759 = vst [vmem:[%s1632_s23 + $0x30] sm:$0xff] %v1017_v9  ;;  %v1018_v10 = vpop.f32.mrb[14].mxu1 }
 0x22b   : > { %v1019_v11 = vpop.f32.mrb[15].mxu1 }
 0x22c   : > { %v1020_v12 = vadd.f32 %v1019_v11, %v1018_v10 }
 0x22e   : > { %760 = vst [vmem:[%s1632_s23 + $0x38] sm:$0xff] %v1020_v12 }
 0x22f   : > { %1200 = shalt.err (!%p1197_p9)
}
 0x230   : > { %s1201_s10 = scalar_lea.hbm %s1646_s8, 1024  ;;  %s1205_s23 = scalar_lea.hbm %s1700_s5, 2048 }
 0x231   : > { %p1202_p10 = scmp.ne.s32.totalorder %s1646_s8, %s1201_s10  ;;  %p1206_p13 = scmp.lt.u32.totalorder %s1646_s8, %s1700_s5 }
 0x232   : > { %p1207_p0 = scmp.lt.u32.totalorder %s1205_s23, %s1201_s10  ;;  %p1209_p2 = scmp.lt.u32.totalorder %s1201_s10, %s1646_s8 }
 0x233   : > { %p1203_p11 = pnand %p1202_p10, %p1327_p5 }
 0x234   : > { %p1208_p1 = por %p1207_p0, %p1206_p13 }
 0x235   : > { %p1204_p12 = pneg %p1203_p11 }
 0x236   : > { %p1210_p3 = por %p1209_p2, %p1208_p1 }
 0x238   : > { %p1211_p4 = pnand %p1210_p3, %p1204_p12 }
 0x23a   : > { %1214 = shalt.err (!%p1211_p4)
}
 0x23b   : > { %1094 = dma.vmem_to_hbm [thread:$0]  (%p1327_p5), %s1648_s15, 1024, %s1646_s8, %s767_s30, %s1256_s13, %s1256_s13, %s1257_s14  }
 0x23c PF: > { %p1104_p7 = scmp.ge.s32.totalorder %s1253_s21, 2  ;;  %s811_s25 = sand.u32 1, %s1241_s18  }
 0x23d   : > { %s812_s6 = scalar_lea.sflag [#allocation3], %s811_s25 }
 0x23e   : > { %p1098_p8 = pnand %p1104_p7, %p1331_p6 }
 0x240   : > { %1232 = dma.done.wait (!%p1098_p8), %s812_s6, 4096  }
 0x241   : > { %1234 = vsyncadd (!%p1098_p8), %s812_s6, 4294963200  ;;  %s821_s28 = scalar_lea.sflag [#allocation5], %s811_s25 }
 0x242   : > { %1236 = dma.done.wait (!%p1098_p8), %s821_s28, 1024  }
 0x243   : > { %1238 = vsyncadd (!%p1098_p8), %s821_s28, 4294966272  ;;  %p19_p5 = scmp.ge.s32.totalorder %s1314_s24, 4   ;;  %s1703_s18 = smov %s1245_s19 }
 0x244   : > { %s1704_s19 = smov %s1249_s20  ;;  %s1705_s20 = smov %s1325_s27 }
 0x245   : > { %s1706_s21 = smov %s1314_s24  ;;  %21 = sbr.rel (!%p19_p5) target bundleno = 5 (0x5), region = 88 }
 0x24c   :  { %826 = vsyncpa [#allocation3], 1 }
 0x24d   :  { %828 = vsyncpa [#allocation3 + $0x1], 1 }
 0x24e   :  { %829 = vsyncpa [#allocation5], 1 }
 0x24f   :  { %831 = vsyncpa [#allocation5 + $0x1], 1 }

</bundles_post_ra>
